<compile_context>
chip_gen: v7x
topology: tpu7x:2x2x1
jax: 0.10.0
libtpu: 0.0.40
codegen_flags: <defaults>
</compile_context>

<pallas_src>
import functools
import math

import numpy as np
import jax
import jax.numpy as jnp
from jax.experimental import pallas as pl
from jax.experimental.pallas import tpu as pltpu

LN_EPS = 1e-5
LEAKY_SLOPE = 0.01  # F.leaky_relu default negative_slope


def _layer_norm(x, gamma, beta):
    mu = jnp.mean(x, axis=-1, keepdims=True)
    var = jnp.mean((x - mu) ** 2, axis=-1, keepdims=True)
    return (x - mu) * jax.lax.rsqrt(var + LN_EPS) * gamma + beta


def encoder_layer_kernel(
    x_ref, pos_ref,
    wqk_ref, bqk_ref, wv_ref, bv_ref, wo_ref, bo_ref,
    g1_ref, be1_ref, g2_ref, be2_ref,
    w1_ref, b1_ref, w2_ref, b2_ref,
    out_ref,
    *, nhead, head_dim, compute_dtype,
):
    # TODO(synk): src_mask / src_key_padding_mask (both None in HANet's usage)
    # are not implemented.
    E = nhead * head_dim
    cd = compute_dtype

    x = x_ref[0].astype(jnp.float32)      # (L, E)
    pos = pos_ref[0].astype(jnp.float32)  # (L, E)

    # ---- pre-norm 1 (kept in f32) ----
    xn = _layer_norm(x, g1_ref[...], be1_ref[...])
    qk_in = xn + pos                      # q == k input (pos-embedded); v input = xn

    # ---- fused Q|K projection (softmax scale pre-folded into Q half) + V ----
    # Weights are already (in, out): no transposes inside the kernel.
    qk = jnp.dot(qk_in.astype(cd), wqk_ref[...],
                 preferred_element_type=jnp.float32) + bqk_ref[...]   # (L, 2E)
    v = jnp.dot(xn.astype(cd), wv_ref[...],
                preferred_element_type=jnp.float32) + bv_ref[...]     # (L, E)

    # ---- multi-head attention as head-leading batched contractions ----
    hd = head_dim
    qh = jnp.stack([qk[:, h * hd:(h + 1) * hd] for h in range(nhead)], axis=0)
    kh = jnp.stack([qk[:, E + h * hd:E + (h + 1) * hd] for h in range(nhead)], axis=0)
    vh = jnp.stack([v[:, h * hd:(h + 1) * hd] for h in range(nhead)], axis=0)

    s = jnp.einsum('hqd,hkd->hqk', qh.astype(cd), kh.astype(cd),
                   preferred_element_type=jnp.float32)                # (H, L, L)
    s = s - jnp.max(s, axis=-1, keepdims=True)
    p = jnp.exp(s)
    p = p * pl.reciprocal(jnp.sum(p, axis=-1, keepdims=True), approx=True)
    a = jnp.einsum('hqk,hkd->hqd', p.astype(cd), vh.astype(cd),
                   preferred_element_type=jnp.float32)                # (H, L, hd)
    attn = jnp.concatenate([a[h] for h in range(nhead)], axis=-1)     # (L, E)

    attn = jnp.dot(attn.astype(cd), wo_ref[...],
                   preferred_element_type=jnp.float32) + bo_ref[...]

    src = x + attn                        # residual 1 (dropout1 == identity)

    # ---- pre-norm 2 + feed-forward ----
    sn = _layer_norm(src, g2_ref[...], be2_ref[...])
    h1 = jnp.dot(sn.astype(cd), w1_ref[...],
                 preferred_element_type=jnp.float32) + b1_ref[...]
    h1 = jnp.where(h1 > 0, h1, LEAKY_SLOPE * h1)                      # leaky_relu
    h2 = jnp.dot(h1.astype(cd), w2_ref[...],
                 preferred_element_type=jnp.float32) + b2_ref[...]

    out_ref[0] = (src + h2).astype(out_ref.dtype)   # residual 2 (dropout2 == id)


def prepare_params(params, *, nhead, compute_dtype):
    """Wrapper-side preprocessing: transpose weights to (in, out), fuse Q|K into
    one weight, fold the 1/sqrt(head_dim) softmax scale into the Q projection,
    and reshape biases / LN params to 2D rows. Pure preprocessing cost."""
    (wq, wk, wv, bq, bk, bv, wo, bo,
     g1, be1, g2, be2, w1, b1, w2, b2) = [jnp.asarray(p, jnp.float32) for p in params]
    E = wq.shape[0]
    head_dim = E // nhead
    scale = 1.0 / math.sqrt(head_dim)

    row = lambda u: u.reshape(1, -1)
    cd = compute_dtype

    w_qk = jnp.concatenate([wq * scale, wk], axis=0).T                # (E, 2E)
    b_qk = jnp.concatenate([bq.reshape(-1) * scale, bk.reshape(-1)]).reshape(1, -1)

    return (
        w_qk.astype(cd), b_qk,
        wv.T.astype(cd), row(bv),
        wo.T.astype(cd), row(bo),
        row(g1), row(be1), row(g2), row(be2),
        w1.T.astype(cd), row(b1),
        w2.T.astype(cd), row(b2),
    )


def transformer_encoder_layer(src, pos, params, *, nhead, compute_dtype=jnp.float32):
    """src, pos: (B, L, E) float32 (batch-major). Returns (B, L, E) float32."""
    B, L, E = src.shape
    head_dim = E // nhead
    prepped = prepare_params(params, nhead=nhead, compute_dtype=compute_dtype)

    per_batch = pl.BlockSpec((1, L, E), lambda b: (b, 0, 0))
    # Constant-index full blocks: the index_map never changes, so the pipeline
    # keeps the same weight block resident across grid steps (no re-DMA).
    full = lambda a: pl.BlockSpec(a.shape, lambda b: (0,) * a.ndim)

    kernel = functools.partial(
        encoder_layer_kernel, nhead=nhead, head_dim=head_dim,
        compute_dtype=compute_dtype)

    return pl.pallas_call(
        kernel,
        out_shape=jax.ShapeDtypeStruct((B, L, E), jnp.float32),
        grid_spec=pltpu.PrefetchScalarGridSpec(
            num_scalar_prefetch=0,
            grid=(B,),
            in_specs=[per_batch, per_batch] + [full(w) for w in prepped],
            out_specs=per_batch,
        ),
        compiler_params=pltpu.CompilerParams(
            dimension_semantics=("parallel",),
            vmem_limit_bytes=48 * 1024 * 1024,
        ),
    )(src, pos, *prepped)


def reference(src, pos, params, *, nhead):
    """Pure-JAX reference of forward_pre (dropout = identity), raw params."""
    (wq, wk, wv, bq, bk, bv, wo, bo,
     g1, be1, g2, be2, w1, b1, w2, b2) = params
    B, L, E = src.shape
    hd = E // nhead

    xn = _layer_norm(src, g1, be1)
    q_in = xn + pos
    Q = q_in @ wq.T + bq
    K = q_in @ wk.T + bk
    V = xn @ wv.T + bv
    Qh = Q.reshape(B, L, nhead, hd).transpose(0, 2, 1, 3)
    Kh = K.reshape(B, L, nhead, hd).transpose(0, 2, 1, 3)
    Vh = V.reshape(B, L, nhead, hd).transpose(0, 2, 1, 3)
    s = jnp.einsum('bhqd,bhkd->bhqk', Qh, Kh) / math.sqrt(hd)
    p = jax.nn.softmax(s, axis=-1)
    a = jnp.einsum('bhqk,bhkd->bhqd', p, Vh).transpose(0, 2, 1, 3).reshape(B, L, E)
    a = a @ wo.T + bo
    src = src + a
    sn = _layer_norm(src, g2, be2)
    h1 = sn @ w1.T + b1
    h1 = jnp.where(h1 > 0, h1, LEAKY_SLOPE * h1)
    h2 = h1 @ w2.T + b2
    return src + h2


if __name__ == "__main__":
    B, L, E, NHEAD, FF = 2, 8, 32, 4, 64

    key = jax.random.PRNGKey(0)
    ks = jax.random.split(key, 16)

    def rnd(k, shape, scale=0.05):
        return jax.random.normal(k, shape, dtype=jnp.float32) * scale

    # MultiheadAttention params (in_proj split into q/k/v) in PyTorch layout.
    wq, wk, wv = rnd(ks[0], (E, E)), rnd(ks[1], (E, E)), rnd(ks[2], (E, E))
    bq, bk, bv = rnd(ks[3], (E,)), rnd(ks[4], (E,)), rnd(ks[5], (E,))
    wo, bo = rnd(ks[6], (E, E)), rnd(ks[7], (E,))
    # LayerNorm params
    g1, be1 = jnp.ones((E,), jnp.float32), jnp.zeros((E,), jnp.float32)
    g2, be2 = jnp.ones((E,), jnp.float32), jnp.zeros((E,), jnp.float32)
    # FFN params
    w1, b1 = rnd(ks[8], (FF, E)), rnd(ks[9], (FF,))
    w2, b2 = rnd(ks[10], (E, FF)), rnd(ks[11], (E,))

    params = (wq, wk, wv, bq, bk, bv, wo, bo, g1, be1, g2, be2, w1, b1, w2, b2)

    src = jax.random.normal(ks[12], (B, L, E), dtype=jnp.float32)
    pos = jax.random.normal(ks[13], (B, L, E), dtype=jnp.float32) * 0.1

    ref = jax.block_until_ready(reference(src, pos, params, nhead=NHEAD))

    # fp32 MXU path (keep fp32 elementwise everywhere -- v5e friendly).
    out_f32 = jax.block_until_ready(
        transformer_encoder_layer(src, pos, params, nhead=NHEAD,
                                  compute_dtype=jnp.float32))
    assert out_f32.shape == (B, L, E)
    err_f32 = float(np.max(np.abs(np.asarray(out_f32) - np.asarray(ref))))
    assert np.allclose(np.asarray(out_f32), np.asarray(ref),
                       atol=5e-3, rtol=5e-3), err_f32

    # bf16 MXU inputs with f32 accumulation -- preferred on v6e / v7x.
    out_bf16 = jax.block_until_ready(
        transformer_encoder_layer(src, pos, params, nhead=NHEAD,
                                  compute_dtype=jnp.bfloat16))
    err_bf16 = float(np.max(np.abs(np.asarray(out_bf16) - np.asarray(ref))))
    assert np.allclose(np.asarray(out_bf16), np.asarray(ref),
                       atol=5e-2, rtol=5e-2), err_bf16

    print("KERNEL_OK")
</pallas_src>

<mosaic_0001>
module attributes {stable_mosaic.version = 11 : i64} {
  func.func @encoder_layer_kernel(%arg0: i32, %arg1: memref<1x8x32xf32, #tpu.memory_space<vmem>>, %arg2: memref<1x8x32xf32, #tpu.memory_space<vmem>>, %arg3: memref<32x64xf32, #tpu.memory_space<vmem>>, %arg4: memref<1x64xf32, #tpu.memory_space<vmem>>, %arg5: memref<32x32xf32, #tpu.memory_space<vmem>>, %arg6: memref<1x32xf32, #tpu.memory_space<vmem>>, %arg7: memref<32x32xf32, #tpu.memory_space<vmem>>, %arg8: memref<1x32xf32, #tpu.memory_space<vmem>>, %arg9: memref<1x32xf32, #tpu.memory_space<vmem>>, %arg10: memref<1x32xf32, #tpu.memory_space<vmem>>, %arg11: memref<1x32xf32, #tpu.memory_space<vmem>>, %arg12: memref<1x32xf32, #tpu.memory_space<vmem>>, %arg13: memref<32x64xf32, #tpu.memory_space<vmem>>, %arg14: memref<1x64xf32, #tpu.memory_space<vmem>>, %arg15: memref<64x32xf32, #tpu.memory_space<vmem>>, %arg16: memref<1x32xf32, #tpu.memory_space<vmem>>, %arg17: memref<1x8x32xf32, #tpu.memory_space<vmem>>) attributes {dimension_semantics = [#tpu.dimension_semantics<parallel>], iteration_bounds = array<i64: 2>, scalar_prefetch = 0 : i64, scratch_operands = 0 : i64, tpu.core_type = #tpu.core_type<tc>, window_params = [{transform_indices = @transform_0, window_bounds = array<i64: 1, 8, 32>}, {transform_indices = @transform_1, window_bounds = array<i64: 1, 8, 32>}, {pipeline_mode = #tpu.pipeline_mode<synchronous>, transform_indices = @transform_2, window_bounds = array<i64: 32, 64>}, {pipeline_mode = #tpu.pipeline_mode<synchronous>, transform_indices = @transform_3, window_bounds = array<i64: 1, 64>}, {pipeline_mode = #tpu.pipeline_mode<synchronous>, transform_indices = @transform_4, window_bounds = array<i64: 32, 32>}, {pipeline_mode = #tpu.pipeline_mode<synchronous>, transform_indices = @transform_5, window_bounds = array<i64: 1, 32>}, {pipeline_mode = #tpu.pipeline_mode<synchronous>, transform_indices = @transform_6, window_bounds = array<i64: 32, 32>}, {pipeline_mode = #tpu.pipeline_mode<synchronous>, transform_indices = @transform_7, window_bounds = array<i64: 1, 32>}, {pipeline_mode = #tpu.pipeline_mode<synchronous>, transform_indices = @transform_8, window_bounds = array<i64: 1, 32>}, {pipeline_mode = #tpu.pipeline_mode<synchronous>, transform_indices = @transform_9, window_bounds = array<i64: 1, 32>}, {pipeline_mode = #tpu.pipeline_mode<synchronous>, transform_indices = @transform_10, window_bounds = array<i64: 1, 32>}, {pipeline_mode = #tpu.pipeline_mode<synchronous>, transform_indices = @transform_11, window_bounds = array<i64: 1, 32>}, {pipeline_mode = #tpu.pipeline_mode<synchronous>, transform_indices = @transform_12, window_bounds = array<i64: 32, 64>}, {pipeline_mode = #tpu.pipeline_mode<synchronous>, transform_indices = @transform_13, window_bounds = array<i64: 1, 64>}, {pipeline_mode = #tpu.pipeline_mode<synchronous>, transform_indices = @transform_14, window_bounds = array<i64: 64, 32>}, {pipeline_mode = #tpu.pipeline_mode<synchronous>, transform_indices = @transform_15, window_bounds = array<i64: 1, 32>}, {transform_indices = @transform_16, window_bounds = array<i64: 1, 8, 32>}]} {
    %c0 = arith.constant 0 : index
    %c0_0 = arith.constant 0 : index
    %c0_1 = arith.constant 0 : index
    %0 = vector.load %arg1[%c0, %c0_0, %c0_1] : memref<1x8x32xf32, #tpu.memory_space<vmem>>, vector<1x8x32xf32>
    %1 = vector.shape_cast %0 : vector<1x8x32xf32> to vector<8x32xf32>
    %c0_2 = arith.constant 0 : index
    %c0_3 = arith.constant 0 : index
    %c0_4 = arith.constant 0 : index
    %2 = vector.load %arg2[%c0_2, %c0_3, %c0_4] : memref<1x8x32xf32, #tpu.memory_space<vmem>>, vector<1x8x32xf32>
    %3 = vector.shape_cast %2 : vector<1x8x32xf32> to vector<8x32xf32>
    %c0_5 = arith.constant 0 : index
    %c0_6 = arith.constant 0 : index
    %4 = vector.load %arg9[%c0_5, %c0_6] : memref<1x32xf32, #tpu.memory_space<vmem>>, vector<1x32xf32>
    %c0_7 = arith.constant 0 : index
    %c0_8 = arith.constant 0 : index
    %5 = vector.load %arg10[%c0_7, %c0_8] : memref<1x32xf32, #tpu.memory_space<vmem>>, vector<1x32xf32>
    %cst = arith.constant dense<0.000000e+00> : vector<8xf32>
    %6 = vector.multi_reduction <add>, %1, %cst [1] : vector<8x32xf32> to vector<8xf32>
    %7 = vector.shape_cast %6 : vector<8xf32> to vector<8x1xf32>
    %cst_9 = arith.constant 3.200000e+01 : f32
    %8 = vector.broadcast %cst_9 : f32 to vector<8x1xf32>
    %9 = arith.divf %7, %8 : vector<8x1xf32>
    %10 = vector.broadcast %9 : vector<8x1xf32> to vector<8x32xf32>
    %11 = arith.subf %1, %10 : vector<8x32xf32>
    %12 = arith.mulf %11, %11 : vector<8x32xf32>
    %cst_10 = arith.constant dense<0.000000e+00> : vector<8xf32>
    %13 = vector.multi_reduction <add>, %12, %cst_10 [1] : vector<8x32xf32> to vector<8xf32>
    %14 = vector.shape_cast %13 : vector<8xf32> to vector<8x1xf32>
    %cst_11 = arith.constant 3.200000e+01 : f32
    %15 = vector.broadcast %cst_11 : f32 to vector<8x1xf32>
    %16 = arith.divf %14, %15 : vector<8x1xf32>
    %17 = vector.broadcast %9 : vector<8x1xf32> to vector<8x32xf32>
    %18 = arith.subf %1, %17 : vector<8x32xf32>
    %cst_12 = arith.constant 9.99999974E-6 : f32
    %19 = vector.broadcast %cst_12 : f32 to vector<8x1xf32>
    %20 = arith.addf %16, %19 : vector<8x1xf32>
    %21 = math.rsqrt %20 : vector<8x1xf32>
    %22 = vector.broadcast %21 : vector<8x1xf32> to vector<8x32xf32>
    %23 = arith.mulf %18, %22 : vector<8x32xf32>
    %24 = vector.broadcast %4 : vector<1x32xf32> to vector<8x32xf32>
    %25 = arith.mulf %23, %24 : vector<8x32xf32>
    %26 = vector.broadcast %5 : vector<1x32xf32> to vector<8x32xf32>
    %27 = arith.addf %25, %26 : vector<8x32xf32>
    %28 = arith.addf %27, %3 : vector<8x32xf32>
    %c0_13 = arith.constant 0 : index
    %c0_14 = arith.constant 0 : index
    %29 = vector.load %arg3[%c0_13, %c0_14] : memref<32x64xf32, #tpu.memory_space<vmem>>, vector<32x64xf32>
    %cst_15 = arith.constant dense<0.000000e+00> : vector<8x64xf32>
    %30 = tpu.matmul %28, %29, %cst_15 {dimension_numbers = #tpu.dot_dimension_numbers<[1], [0], [0], [1], [0, 0, 1, 1], [], []>} : vector<8x32xf32>, vector<32x64xf32>, vector<8x64xf32> -> vector<8x64xf32>
    %c0_16 = arith.constant 0 : index
    %c0_17 = arith.constant 0 : index
    %31 = vector.load %arg4[%c0_16, %c0_17] : memref<1x64xf32, #tpu.memory_space<vmem>>, vector<1x64xf32>
    %32 = vector.broadcast %31 : vector<1x64xf32> to vector<8x64xf32>
    %33 = arith.addf %30, %32 : vector<8x64xf32>
    %c0_18 = arith.constant 0 : index
    %c0_19 = arith.constant 0 : index
    %34 = vector.load %arg5[%c0_18, %c0_19] : memref<32x32xf32, #tpu.memory_space<vmem>>, vector<32x32xf32>
    %cst_20 = arith.constant dense<0.000000e+00> : vector<8x32xf32>
    %35 = tpu.matmul %27, %34, %cst_20 {dimension_numbers = #tpu.dot_dimension_numbers<[1], [0], [0], [1], [0, 0, 1, 1], [], []>} : vector<8x32xf32>, vector<32x32xf32>, vector<8x32xf32> -> vector<8x32xf32>
    %c0_21 = arith.constant 0 : index
    %c0_22 = arith.constant 0 : index
    %36 = vector.load %arg6[%c0_21, %c0_22] : memref<1x32xf32, #tpu.memory_space<vmem>>, vector<1x32xf32>
    %37 = vector.broadcast %36 : vector<1x32xf32> to vector<8x32xf32>
    %38 = arith.addf %35, %37 : vector<8x32xf32>
    %39 = vector.extract_strided_slice %33 {offsets = [0, 0], sizes = [8, 8], strides = [1, 1]} : vector<8x64xf32> to vector<8x8xf32>
    %40 = vector.extract_strided_slice %33 {offsets = [0, 8], sizes = [8, 8], strides = [1, 1]} : vector<8x64xf32> to vector<8x8xf32>
    %41 = vector.extract_strided_slice %33 {offsets = [0, 16], sizes = [8, 8], strides = [1, 1]} : vector<8x64xf32> to vector<8x8xf32>
    %42 = vector.extract_strided_slice %33 {offsets = [0, 24], sizes = [8, 8], strides = [1, 1]} : vector<8x64xf32> to vector<8x8xf32>
    %43 = vector.shape_cast %39 : vector<8x8xf32> to vector<1x8x8xf32>
    %44 = vector.shape_cast %40 : vector<8x8xf32> to vector<1x8x8xf32>
    %45 = vector.shape_cast %41 : vector<8x8xf32> to vector<1x8x8xf32>
    %46 = vector.shape_cast %42 : vector<8x8xf32> to vector<1x8x8xf32>
    %47 = tpu.concatenate %43, %44, %45, %46 in 0 : vector<1x8x8xf32>, vector<1x8x8xf32>, vector<1x8x8xf32>, vector<1x8x8xf32> -> vector<4x8x8xf32>
    %48 = vector.extract_strided_slice %33 {offsets = [0, 32], sizes = [8, 8], strides = [1, 1]} : vector<8x64xf32> to vector<8x8xf32>
    %49 = vector.extract_strided_slice %33 {offsets = [0, 40], sizes = [8, 8], strides = [1, 1]} : vector<8x64xf32> to vector<8x8xf32>
    %50 = vector.extract_strided_slice %33 {offsets = [0, 48], sizes = [8, 8], strides = [1, 1]} : vector<8x64xf32> to vector<8x8xf32>
    %51 = vector.extract_strided_slice %33 {offsets = [0, 56], sizes = [8, 8], strides = [1, 1]} : vector<8x64xf32> to vector<8x8xf32>
    %52 = vector.shape_cast %48 : vector<8x8xf32> to vector<1x8x8xf32>
    %53 = vector.shape_cast %49 : vector<8x8xf32> to vector<1x8x8xf32>
    %54 = vector.shape_cast %50 : vector<8x8xf32> to vector<1x8x8xf32>
    %55 = vector.shape_cast %51 : vector<8x8xf32> to vector<1x8x8xf32>
    %56 = tpu.concatenate %52, %53, %54, %55 in 0 : vector<1x8x8xf32>, vector<1x8x8xf32>, vector<1x8x8xf32>, vector<1x8x8xf32> -> vector<4x8x8xf32>
    %57 = vector.extract_strided_slice %38 {offsets = [0, 0], sizes = [8, 8], strides = [1, 1]} : vector<8x32xf32> to vector<8x8xf32>
    %58 = vector.extract_strided_slice %38 {offsets = [0, 8], sizes = [8, 8], strides = [1, 1]} : vector<8x32xf32> to vector<8x8xf32>
    %59 = vector.extract_strided_slice %38 {offsets = [0, 16], sizes = [8, 8], strides = [1, 1]} : vector<8x32xf32> to vector<8x8xf32>
    %60 = vector.extract_strided_slice %38 {offsets = [0, 24], sizes = [8, 8], strides = [1, 1]} : vector<8x32xf32> to vector<8x8xf32>
    %61 = vector.shape_cast %57 : vector<8x8xf32> to vector<1x8x8xf32>
    %62 = vector.shape_cast %58 : vector<8x8xf32> to vector<1x8x8xf32>
    %63 = vector.shape_cast %59 : vector<8x8xf32> to vector<1x8x8xf32>
    %64 = vector.shape_cast %60 : vector<8x8xf32> to vector<1x8x8xf32>
    %65 = tpu.concatenate %61, %62, %63, %64 in 0 : vector<1x8x8xf32>, vector<1x8x8xf32>, vector<1x8x8xf32>, vector<1x8x8xf32> -> vector<4x8x8xf32>
    "tpu.trace_start"() <{level = 10 : i32, message = "hqd,hkd->hqk"}> : () -> ()
    %cst_23 = arith.constant dense<0.000000e+00> : vector<4x8x8xf32>
    %66 = tpu.matmul %47, %56, %cst_23 {dimension_numbers = #tpu.dot_dimension_numbers<[2], [2], [1], [1], [0, 0, 0, 1, 1, 1], [0], [0]>} : vector<4x8x8xf32>, vector<4x8x8xf32>, vector<4x8x8xf32> -> vector<4x8x8xf32>
    "tpu.trace_stop"() : () -> ()
    %cst_24 = arith.constant dense<0xFF800000> : vector<4x8xf32>
    %67 = vector.multi_reduction <maximumf>, %66, %cst_24 [2] : vector<4x8x8xf32> to vector<4x8xf32>
    %68 = vector.shape_cast %67 : vector<4x8xf32> to vector<4x8x1xf32>
    %69 = vector.broadcast %68 : vector<4x8x1xf32> to vector<4x8x8xf32>
    %70 = arith.subf %66, %69 : vector<4x8x8xf32>
    %71 = math.exp %70 : vector<4x8x8xf32>
    %cst_25 = arith.constant dense<0.000000e+00> : vector<4x8xf32>
    %72 = vector.multi_reduction <add>, %71, %cst_25 [2] : vector<4x8x8xf32> to vector<4x8xf32>
    %73 = vector.shape_cast %72 : vector<4x8xf32> to vector<4x8x1xf32>
    %74 = tpu.reciprocal %73 {approx = true} : vector<4x8x1xf32> -> vector<4x8x1xf32>
    %75 = vector.broadcast %74 : vector<4x8x1xf32> to vector<4x8x8xf32>
    %76 = arith.mulf %71, %75 : vector<4x8x8xf32>
    "tpu.trace_start"() <{level = 10 : i32, message = "hqk,hkd->hqd"}> : () -> ()
    %cst_26 = arith.constant dense<0.000000e+00> : vector<4x8x8xf32>
    %77 = tpu.matmul %76, %65, %cst_26 {dimension_numbers = #tpu.dot_dimension_numbers<[2], [1], [1], [2], [0, 0, 0, 1, 1, 2], [0], [0]>} : vector<4x8x8xf32>, vector<4x8x8xf32>, vector<4x8x8xf32> -> vector<4x8x8xf32>
    "tpu.trace_stop"() : () -> ()
    %78 = vector.extract_strided_slice %77 {offsets = [0, 0, 0], sizes = [1, 8, 8], strides = [1, 1, 1]} : vector<4x8x8xf32> to vector<1x8x8xf32>
    %79 = vector.shape_cast %78 : vector<1x8x8xf32> to vector<8x8xf32>
    %80 = vector.extract_strided_slice %77 {offsets = [1, 0, 0], sizes = [1, 8, 8], strides = [1, 1, 1]} : vector<4x8x8xf32> to vector<1x8x8xf32>
    %81 = vector.shape_cast %80 : vector<1x8x8xf32> to vector<8x8xf32>
    %82 = vector.extract_strided_slice %77 {offsets = [2, 0, 0], sizes = [1, 8, 8], strides = [1, 1, 1]} : vector<4x8x8xf32> to vector<1x8x8xf32>
    %83 = vector.shape_cast %82 : vector<1x8x8xf32> to vector<8x8xf32>
    %84 = vector.extract_strided_slice %77 {offsets = [3, 0, 0], sizes = [1, 8, 8], strides = [1, 1, 1]} : vector<4x8x8xf32> to vector<1x8x8xf32>
    %85 = vector.shape_cast %84 : vector<1x8x8xf32> to vector<8x8xf32>
    %86 = tpu.concatenate %79, %81, %83, %85 in 1 : vector<8x8xf32>, vector<8x8xf32>, vector<8x8xf32>, vector<8x8xf32> -> vector<8x32xf32>
    %c0_27 = arith.constant 0 : index
    %c0_28 = arith.constant 0 : index
    %87 = vector.load %arg7[%c0_27, %c0_28] : memref<32x32xf32, #tpu.memory_space<vmem>>, vector<32x32xf32>
    %cst_29 = arith.constant dense<0.000000e+00> : vector<8x32xf32>
    %88 = tpu.matmul %86, %87, %cst_29 {dimension_numbers = #tpu.dot_dimension_numbers<[1], [0], [0], [1], [0, 0, 1, 1], [], []>} : vector<8x32xf32>, vector<32x32xf32>, vector<8x32xf32> -> vector<8x32xf32>
    %c0_30 = arith.constant 0 : index
    %c0_31 = arith.constant 0 : index
    %89 = vector.load %arg8[%c0_30, %c0_31] : memref<1x32xf32, #tpu.memory_space<vmem>>, vector<1x32xf32>
    %90 = vector.broadcast %89 : vector<1x32xf32> to vector<8x32xf32>
    %91 = arith.addf %88, %90 : vector<8x32xf32>
    %92 = arith.addf %1, %91 : vector<8x32xf32>
    %c0_32 = arith.constant 0 : index
    %c0_33 = arith.constant 0 : index
    %93 = vector.load %arg11[%c0_32, %c0_33] : memref<1x32xf32, #tpu.memory_space<vmem>>, vector<1x32xf32>
    %c0_34 = arith.constant 0 : index
    %c0_35 = arith.constant 0 : index
    %94 = vector.load %arg12[%c0_34, %c0_35] : memref<1x32xf32, #tpu.memory_space<vmem>>, vector<1x32xf32>
    %cst_36 = arith.constant dense<0.000000e+00> : vector<8xf32>
    %95 = vector.multi_reduction <add>, %92, %cst_36 [1] : vector<8x32xf32> to vector<8xf32>
    %96 = vector.shape_cast %95 : vector<8xf32> to vector<8x1xf32>
    %cst_37 = arith.constant 3.200000e+01 : f32
    %97 = vector.broadcast %cst_37 : f32 to vector<8x1xf32>
    %98 = arith.divf %96, %97 : vector<8x1xf32>
    %99 = vector.broadcast %98 : vector<8x1xf32> to vector<8x32xf32>
    %100 = arith.subf %92, %99 : vector<8x32xf32>
    %101 = arith.mulf %100, %100 : vector<8x32xf32>
    %cst_38 = arith.constant dense<0.000000e+00> : vector<8xf32>
    %102 = vector.multi_reduction <add>, %101, %cst_38 [1] : vector<8x32xf32> to vector<8xf32>
    %103 = vector.shape_cast %102 : vector<8xf32> to vector<8x1xf32>
    %cst_39 = arith.constant 3.200000e+01 : f32
    %104 = vector.broadcast %cst_39 : f32 to vector<8x1xf32>
    %105 = arith.divf %103, %104 : vector<8x1xf32>
    %106 = vector.broadcast %98 : vector<8x1xf32> to vector<8x32xf32>
    %107 = arith.subf %92, %106 : vector<8x32xf32>
    %cst_40 = arith.constant 9.99999974E-6 : f32
    %108 = vector.broadcast %cst_40 : f32 to vector<8x1xf32>
    %109 = arith.addf %105, %108 : vector<8x1xf32>
    %110 = math.rsqrt %109 : vector<8x1xf32>
    %111 = vector.broadcast %110 : vector<8x1xf32> to vector<8x32xf32>
    %112 = arith.mulf %107, %111 : vector<8x32xf32>
    %113 = vector.broadcast %93 : vector<1x32xf32> to vector<8x32xf32>
    %114 = arith.mulf %112, %113 : vector<8x32xf32>
    %115 = vector.broadcast %94 : vector<1x32xf32> to vector<8x32xf32>
    %116 = arith.addf %114, %115 : vector<8x32xf32>
    %c0_41 = arith.constant 0 : index
    %c0_42 = arith.constant 0 : index
    %117 = vector.load %arg13[%c0_41, %c0_42] : memref<32x64xf32, #tpu.memory_space<vmem>>, vector<32x64xf32>
    %cst_43 = arith.constant dense<0.000000e+00> : vector<8x64xf32>
    %118 = tpu.matmul %116, %117, %cst_43 {dimension_numbers = #tpu.dot_dimension_numbers<[1], [0], [0], [1], [0, 0, 1, 1], [], []>} : vector<8x32xf32>, vector<32x64xf32>, vector<8x64xf32> -> vector<8x64xf32>
    %c0_44 = arith.constant 0 : index
    %c0_45 = arith.constant 0 : index
    %119 = vector.load %arg14[%c0_44, %c0_45] : memref<1x64xf32, #tpu.memory_space<vmem>>, vector<1x64xf32>
    %120 = vector.broadcast %119 : vector<1x64xf32> to vector<8x64xf32>
    %121 = arith.addf %118, %120 : vector<8x64xf32>
    %cst_46 = arith.constant 0.000000e+00 : f32
    %122 = vector.broadcast %cst_46 : f32 to vector<8x64xf32>
    %123 = arith.cmpf ogt, %121, %122 : vector<8x64xf32>
    %cst_47 = arith.constant 0.00999999977 : f32
    %124 = vector.broadcast %cst_47 : f32 to vector<8x64xf32>
    %125 = arith.mulf %124, %121 : vector<8x64xf32>
    %126 = arith.select %123, %121, %125 : vector<8x64xi1>, vector<8x64xf32>
    %c0_48 = arith.constant 0 : index
    %c0_49 = arith.constant 0 : index
    %127 = vector.load %arg15[%c0_48, %c0_49] : memref<64x32xf32, #tpu.memory_space<vmem>>, vector<64x32xf32>
    %cst_50 = arith.constant dense<0.000000e+00> : vector<8x32xf32>
    %128 = tpu.matmul %126, %127, %cst_50 {dimension_numbers = #tpu.dot_dimension_numbers<[1], [0], [0], [1], [0, 0, 1, 1], [], []>} : vector<8x64xf32>, vector<64x32xf32>, vector<8x32xf32> -> vector<8x32xf32>
    %c0_51 = arith.constant 0 : index
    %c0_52 = arith.constant 0 : index
    %129 = vector.load %arg16[%c0_51, %c0_52] : memref<1x32xf32, #tpu.memory_space<vmem>>, vector<1x32xf32>
    %130 = vector.broadcast %129 : vector<1x32xf32> to vector<8x32xf32>
    %131 = arith.addf %128, %130 : vector<8x32xf32>
    %132 = arith.addf %92, %131 : vector<8x32xf32>
    %c0_53 = arith.constant 0 : index
    %c0_54 = arith.constant 0 : index
    %c0_55 = arith.constant 0 : index
    %133 = vector.load %arg17[%c0_53, %c0_54, %c0_55] : memref<1x8x32xf32, #tpu.memory_space<vmem>>, vector<1x8x32xf32>
    %134 = vector.shape_cast %133 : vector<1x8x32xf32> to vector<8x32xf32>
    %135 = vector.shape_cast %132 : vector<8x32xf32> to vector<1x8x32xf32>
    tpu.vector_store %arg17[%c0_53, %c0_54, %c0_55], %135 {strides = array<i32>} : memref<1x8x32xf32, #tpu.memory_space<vmem>>, vector<1x8x32xf32>,
    return
  }
  func.func @transform_0(%arg0: i32) -> (i32, i32, i32) {
    %c0_i32 = arith.constant 0 : i32
    %c0_i32_0 = arith.constant 0 : i32
    %c0_i32_1 = arith.constant 0 : i32
    return %arg0, %c0_i32, %c0_i32_0 : i32, i32, i32
  }
  func.func @transform_1(%arg0: i32) -> (i32, i32, i32) {
    %c0_i32 = arith.constant 0 : i32
    %c0_i32_0 = arith.constant 0 : i32
    %c0_i32_1 = arith.constant 0 : i32
    return %arg0, %c0_i32, %c0_i32_0 : i32, i32, i32
  }
  func.func @transform_2(%arg0: i32) -> (i32, i32) {
    %c0_i32 = arith.constant 0 : i32
    %c0_i32_0 = arith.constant 0 : i32
    %c0_i32_1 = arith.constant 0 : i32
    return %c0_i32, %c0_i32_0 : i32, i32
  }
  func.func @transform_3(%arg0: i32) -> (i32, i32) {
    %c0_i32 = arith.constant 0 : i32
    %c0_i32_0 = arith.constant 0 : i32
    %c0_i32_1 = arith.constant 0 : i32
    return %c0_i32, %c0_i32_0 : i32, i32
  }
  func.func @transform_4(%arg0: i32) -> (i32, i32) {
    %c0_i32 = arith.constant 0 : i32
    %c0_i32_0 = arith.constant 0 : i32
    %c0_i32_1 = arith.constant 0 : i32
    return %c0_i32, %c0_i32_0 : i32, i32
  }
  func.func @transform_5(%arg0: i32) -> (i32, i32) {
    %c0_i32 = arith.constant 0 : i32
    %c0_i32_0 = arith.constant 0 : i32
    %c0_i32_1 = arith.constant 0 : i32
    return %c0_i32, %c0_i32_0 : i32, i32
  }
  func.func @transform_6(%arg0: i32) -> (i32, i32) {
    %c0_i32 = arith.constant 0 : i32
    %c0_i32_0 = arith.constant 0 : i32
    %c0_i32_1 = arith.constant 0 : i32
    return %c0_i32, %c0_i32_0 : i32, i32
  }
  func.func @transform_7(%arg0: i32) -> (i32, i32) {
    %c0_i32 = arith.constant 0 : i32
    %c0_i32_0 = arith.constant 0 : i32
    %c0_i32_1 = arith.constant 0 : i32
    return %c0_i32, %c0_i32_0 : i32, i32
  }
  func.func @transform_8(%arg0: i32) -> (i32, i32) {
    %c0_i32 = arith.constant 0 : i32
    %c0_i32_0 = arith.constant 0 : i32
    %c0_i32_1 = arith.constant 0 : i32
    return %c0_i32, %c0_i32_0 : i32, i32
  }
  func.func @transform_9(%arg0: i32) -> (i32, i32) {
    %c0_i32 = arith.constant 0 : i32
    %c0_i32_0 = arith.constant 0 : i32
    %c0_i32_1 = arith.constant 0 : i32
    return %c0_i32, %c0_i32_0 : i32, i32
  }
  func.func @transform_10(%arg0: i32) -> (i32, i32) {
    %c0_i32 = arith.constant 0 : i32
    %c0_i32_0 = arith.constant 0 : i32
    %c0_i32_1 = arith.constant 0 : i32
    return %c0_i32, %c0_i32_0 : i32, i32
  }
  func.func @transform_11(%arg0: i32) -> (i32, i32) {
    %c0_i32 = arith.constant 0 : i32
    %c0_i32_0 = arith.constant 0 : i32
    %c0_i32_1 = arith.constant 0 : i32
    return %c0_i32, %c0_i32_0 : i32, i32
  }
  func.func @transform_12(%arg0: i32) -> (i32, i32) {
    %c0_i32 = arith.constant 0 : i32
    %c0_i32_0 = arith.constant 0 : i32
    %c0_i32_1 = arith.constant 0 : i32
    return %c0_i32, %c0_i32_0 : i32, i32
  }
  func.func @transform_13(%arg0: i32) -> (i32, i32) {
    %c0_i32 = arith.constant 0 : i32
    %c0_i32_0 = arith.constant 0 : i32
    %c0_i32_1 = arith.constant 0 : i32
    return %c0_i32, %c0_i32_0 : i32, i32
  }
  func.func @transform_14(%arg0: i32) -> (i32, i32) {
    %c0_i32 = arith.constant 0 : i32
    %c0_i32_0 = arith.constant 0 : i32
    %c0_i32_1 = arith.constant 0 : i32
    return %c0_i32, %c0_i32_0 : i32, i32
  }
  func.func @transform_15(%arg0: i32) -> (i32, i32) {
    %c0_i32 = arith.constant 0 : i32
    %c0_i32_0 = arith.constant 0 : i32
    %c0_i32_1 = arith.constant 0 : i32
    return %c0_i32, %c0_i32_0 : i32, i32
  }
  func.func @transform_16(%arg0: i32) -> (i32, i32, i32) {
    %c0_i32 = arith.constant 0 : i32
    %c0_i32_0 = arith.constant 0 : i32
    %c0_i32_1 = arith.constant 0 : i32
    return %arg0, %c0_i32, %c0_i32_0 : i32, i32, i32
  }
}

</mosaic_0001>

<bundles_post_ra>
// kernel: tpu_custom_call.1
= control target key start
LH: loop header
LB: loop body
LE: loop exit
PB: predicated region body
PF: predicated region fallthrough
CT: control target
= control target key end

     0   :  { %s2875_s0 = inlined_call_operand.hbm [shape: f32[2,8,32], index: 0, kind: input, shape index: {}]   ;;  %s2876_s1 = inlined_call_operand.hbm [shape: f32[2,8,32], index: 1, kind: input, shape index: {}]   ;;  %s2877_s2 = inlined_call_operand.vmem [shape: f32[32,64], index: 2, kind: input, shape index: {}]   ;;  %s2878_s3 = inlined_call_operand.vmem [shape: f32[1,64], index: 3, kind: input, shape index: {}]   ;;  %s2879_s4 = inlined_call_operand.vmem [shape: f32[32,32], index: 4, kind: input, shape index: {}]   ;;  %s2880_s5 = inlined_call_operand.vmem [shape: f32[1,32], index: 5, kind: input, shape index: {}]   ;;  %s2881_s6 = inlined_call_operand.vmem [shape: f32[32,32], index: 6, kind: input, shape index: {}]   ;;  %s2882_s7 = inlined_call_operand.vmem [shape: f32[1,32], index: 7, kind: input, shape index: {}]   ;;  %s2883_s8 = inlined_call_operand.vmem [shape: f32[1,32], index: 8, kind: input, shape index: {}]   ;;  %s2884_s9 = inlined_call_operand.vmem [shape: f32[1,32], index: 9, kind: input, shape index: {}]   ;;  %s2885_s10 = inlined_call_operand.vmem [shape: f32[1,32], index: 10, kind: input, shape index: {}]   ;;  %s2886_s11 = inlined_call_operand.vmem [shape: f32[1,32], index: 11, kind: input, shape index: {}]   ;;  %s2887_s12 = inlined_call_operand.hbm [shape: f32[32,64], index: 12, kind: input, shape index: {}]   ;;  %s2888_s13 = inlined_call_operand.vmem [shape: f32[1,64], index: 13, kind: input, shape index: {}]   ;;  %s2889_s14 = inlined_call_operand.vmem [shape: f32[64,32], index: 14, kind: input, shape index: {}]   ;;  %s2890_s15 = inlined_call_operand.vmem [shape: f32[1,32], index: 15, kind: input, shape index: {}]   ;;  %s2891_s16 = inlined_call_operand.hbm [shape: f32[2,8,32], index: 16, kind: output, shape index: {}]  }
   0x1   :  { %2906 = sst [smem:[#allocation19_spill]] %s2875_s0 }
   0x2   :  { %2907 = sst [smem:[#allocation20_spill]] %s2885_s10 }
   0x3   :  { %2908 = sst [smem:[#allocation21_spill]] %s2886_s11 }
   0x4   :  { %2909 = sst [smem:[#allocation22_spill]] %s2887_s12 }
   0x5   :  { %2910 = sst [smem:[#allocation23_spill]] %s2888_s13 }
   0x6   :  { %2911 = sst [smem:[#allocation24_spill]] %s2889_s14 }
   0x7   :  { %2912 = sst [smem:[#allocation25_spill]] %s2890_s15 }
   0x8   :  { %2913 = sst [smem:[#allocation26_spill]] %s2891_s16 }
   0x9   :  { %21 = vsyncpa [#allocation3], 0 }
   0xa   :  { %23 = vsyncpa [#allocation3 + $0x1], 0 }
   0xb   :  { %24 = vsyncpa [#allocation6], 0 }
   0xc   :  { %26 = vsyncpa [#allocation6 + $0x1], 0 }
   0xd   :  { %27 = vsyncpa [#allocation4], 0 }
   0xe   :  { %29 = vsyncpa [#allocation4 + $0x1], 0  ;;  %s2459_s21 = smov 0   ;;  %s2461_s22 = smov 0  }
   0xf   :  { %s2463_s23 = smov 0   ;;  %s2465_s24 = smov 0  }
  0x10 LB: > { %2914 = sst [smem:[#allocation13_spill]] %s2344_s21  ;;  %s2480_s25 = sadd.s32 4294967295, %s2356_s24   ;;  %s2356_s24 = sphi %s2465_s24, %s2946_s24   ;;  %s2352_s23 = sphi %s2463_s23, %s2951_s23   ;;  %s2348_s22 = sphi %s2461_s22, %s2950_s22   ;;  %s2344_s21 = sphi %s2459_s21, %s2949_s21  }
  0x11   : > { %2915 = sst [smem:[#allocation14_spill]] %s2352_s23  ;;  %s1873_s26 = sadd.s32 4294967294, %s2356_s24  }
  0x12   : > { %p55_p0 = scmp.ne.s32.totalorder %s2348_s22, %s2344_s21  ;;  %p2898_p1 = scmp.eq.s32.totalorder %s2480_s25, 0 }
  0x13   : > { %p405_p3 = scmp.eq.s32.totalorder %s1873_s26, 1  ;;  %p1874_p5 = scmp.ge.s32.totalorder %s2356_s24, 1 }
  0x14   : > { %p2489_p4 = por %p2898_p1, %p55_p0  ;;  %p412_p7 = scmp.lt.s32.totalorder %s2356_s24, 3 }
  0x15   : > { %p2494_p6 = por %p405_p3, %p55_p0  ;;  %s2358_s30 = smov [#allocation7]  }
  0x16   : > { %s2916_s27 = scalar_select %p2489_p4, 1, 0 }
  0x17   : > { %s2917_s28 = scalar_select %p2494_p6, 1, 0 }
  0x18   : > { %p2499_p8 = pnand %p1874_p5, %p412_p7  ;;  %s454_s0 = sshll.u32 %s2358_s30, 4  ;;  %s2503_s0 = int_to_ptr.vmem [resolvable:$true] %s454_s0 }
  0x19   : > { %2918 = sst [smem:[#allocation15_spill]] %s2917_s28  ;;  %s2515_s18 = sadd.s32 1, %s2356_s24  }
  0x1a   : > { %s2919_s29 = scalar_select %p2499_p8, 1, 0 }
  0x1b   : > { %p2110_p9 = pneg %p2499_p8  ;;  %2921 = sst [smem:[#allocation16_spill]] %s2515_s18 }
  0x1c   : > { %s42_s19 = sadd.s32 1, %s2352_s23  ;;  %s39_s20 = ssub.s32 %s2356_s24, %s2515_s18 }
  0x1d   : > { %p2510_p11 = pnand %p2110_p9, %p2898_p1  ;;  %s2922_s12 = sld [smem:[#allocation22_spill]] }
  0x1f   : > { %p2196_p13 = pneg %p2510_p11 }
  0x23   : > { %s2194_s30 = scalar_lea.hbm %s2922_s12, 512 }
  0x24   : > { %p2195_p12 = scmp.ne.s32.totalorder %s2922_s12, %s2194_s30  ;;  %p2201_p5 = scmp.lt.u32.totalorder %s2194_s30, %s2922_s12 }
  0x26   : > { %p2197_p0 = pnand %p2196_p13, %p2195_p12 }
  0x28   : > { %p2198_p3 = pneg %p2197_p0 }
  0x2a   : > { %p2203_p7 = pnand %p2201_p5, %p2198_p3 }
  0x2c   : > { %2206 = shalt.err (!%p2203_p7)
}
  0x2d   : > { %s2207_s18 = scalar_lea.vmem %s2503_s0, 512  ;;  %p2215_p2 = scmp.lt.s32.totalorder %s2503_s0, %s2503_s0 }
  0x2e   : > { %p2208_p9 = scmp.ne.s32.totalorder %s2503_s0, %s2207_s18  ;;  %p2216_p6 = scmp.lt.s32.totalorder %s2207_s18, %s2207_s18 }
  0x30   : > { %p2210_p10 = pnand %p2208_p9, %p2196_p13  ;;  %p2217_p4 = por %p2216_p6, %p2215_p2 }
  0x32   : > { %p2211_p1 = pneg %p2210_p10 }
  0x34   : > { %p2218_p8 = pnand %p2217_p4, %p2211_p1 }
  0x36   : > { %2221 = shalt.err (!%p2218_p8)
}
  0x37   : > { %s2359_s16 = smov 128   ;;  %s2360_s13 = smov 8  }
  0x38   : > { %2113 = dma.hbm_to_vmem [thread:$0]  (!%p2510_p11), %s2922_s12, 512, %s2503_s0, [#allocation6], %s2359_s16, %s2359_s16, %s2360_s13  }
  0x39   : > { %p40_p2 = scmp.eq.s32.totalorder %s39_s20, 0  ;;  %p49_p1 = scmp.ne.s32.totalorder %s2352_s23, %s2348_s22 }
  0x3a   : > { %p50_p4 = scmp.eq.s32.totalorder %s2356_s24, 0  ;;  %p2126_p6 = scmp.lt.s32.totalorder %s2356_s24, 2 }
  0x3b   : > { %s2546_s28 = scalar_select %p40_p2, %s2352_s23, %s42_s19  }
  0x3c   : > { %p51_p8 = por %p50_p4, %p49_p1  ;;  %p2924_p10 = scmp.eq.s32.totalorder %s2480_s25, 1 }
  0x3d   : > { %2923 = sst [smem:[#allocation17_spill]] %s2546_s28  ;;  %s477_s26 = sand.u32 1, %s2352_s23  }
  0x3e   : > { %p2550_p12 = por %p2924_p10, %p49_p1  ;;  %s1878_s30 = sshll.u32 %s2356_s24, 7 }
  0x3f   : > { %s2556_s11 = sshll.u32 %s477_s26, 3  ;;  %s2927_s15 = sld [smem:[#allocation19_spill]] }
  0x40   : > { %s2925_s18 = scalar_select %p2550_p12, 1, 0 }
  0x41   : > { %s481_s19 = scalar_lea.vmem [#allocation2], %s2556_s11  ;;  %p2564_p11 = pnand %p2126_p6, %p51_p8 }
  0x42   : > { %2926 = sst [smem:[#allocation18_spill]] %s2925_s18  ;;  %s488_s20 = sshll.u32 %s481_s19, 4  ;;  %s2568_s20 = int_to_ptr.vmem [resolvable:$true] %s488_s20 }
  0x43   : > { %s2573_s10 = scalar_lea.hbm %s2876_s1, %s1878_s30  ;;  %s478_s17 = scalar_lea.sflag [#allocation3], %s477_s26 }
  0x44   : > { %p2224_p0 = pneg %p2564_p11 }
  0x45   : > { %s2561_s0 = scalar_lea.hbm %s2927_s15, %s1878_s30  ;;  %s2227_s23 = scalar_lea.hbm %s2927_s15, 256 }
  0x46   : > { %s2222_s12 = scalar_lea.hbm %s2561_s0, 128  ;;  %p2228_p7 = scmp.lt.u32.totalorder %s2561_s0, %s2927_s15 }
  0x47   : > { %p2223_p13 = scmp.ne.s32.totalorder %s2561_s0, %s2222_s12  ;;  %p2229_p9 = scmp.lt.u32.totalorder %s2227_s23, %s2222_s12 }
  0x48   : > { %p2231_p1 = scmp.lt.u32.totalorder %s2222_s12, %s2561_s0 }
  0x49   : > { %p2225_p3 = pnand %p2224_p0, %p2223_p13  ;;  %p2230_p2 = por %p2229_p9, %p2228_p7 }
  0x4b   : > { %p2226_p5 = pneg %p2225_p3  ;;  %p2232_p4 = por %p2231_p1, %p2230_p2 }
  0x4d   : > { %p2233_p6 = pnand %p2232_p4, %p2226_p5 }
  0x4f   : > { %2236 = shalt.err (!%p2233_p6)
}
  0x50   : > { %s2237_s26 = scalar_lea.vmem %s2568_s20, 128  ;;  %s2361_s28 = smov [#allocation2]  }
  0x51   : > { %p2238_p8 = scmp.ne.s32.totalorder %s2568_s20, %s2237_s26  ;;  %s2242_s30 = sshll.u32 %s2361_s28, 4  ;;  %s2243_s30 = int_to_ptr.vmem [resolvable:$false] %s2242_s30 }
  0x52   : > { %s2244_s14 = scalar_lea.vmem %s2243_s30, 256  ;;  %p2245_p3 = scmp.lt.s32.totalorder %s2568_s20, %s2243_s30 }
  0x53   : > { %p2240_p10 = pnand %p2238_p8, %p2224_p0  ;;  %p2246_p7 = scmp.lt.s32.totalorder %s2244_s14, %s2237_s26 }
  0x55   : > { %p2241_p13 = pneg %p2240_p10  ;;  %p2247_p9 = por %p2246_p7, %p2245_p3 }
  0x57   : > { %p2248_p2 = pnand %p2247_p9, %p2241_p13 }
  0x59   : > { %2251 = shalt.err (!%p2248_p2)
}
  0x5a   : > { %2117 = dma.hbm_to_vmem [thread:$0]  (!%p2564_p11), %s2561_s0, 128, %s2568_s20, %s478_s17  }
  0x5b   : > { %s495_s12 = sand.u32 1, %s2356_s24   ;;  %s499_s23 = scalar_lea.vmem [#allocation5], %s2556_s11 }
  0x5c   : > { %s506_s18 = sshll.u32 %s499_s23, 4  ;;  %s496_s13 = scalar_lea.sflag [#allocation6], %s495_s12  ;;  %s507_s18 = int_to_ptr.vmem [resolvable:$true] %s506_s18 }
  0x5d   : > { %s2252_s21 = scalar_lea.hbm %s2573_s10, 128  ;;  %s2257_s28 = scalar_lea.hbm %s2876_s1, 256 }
  0x5e   : > { %p2253_p5 = scmp.ne.s32.totalorder %s2573_s10, %s2252_s21  ;;  %p2258_p6 = scmp.lt.u32.totalorder %s2573_s10, %s2876_s1 }
  0x5f   : > { %p2259_p8 = scmp.lt.u32.totalorder %s2257_s28, %s2252_s21  ;;  %p2261_p13 = scmp.lt.u32.totalorder %s2252_s21, %s2573_s10 }
  0x60   : > { %p2255_p1 = pnand %p2253_p5, %p2224_p0 }
  0x61   : > { %p2260_p10 = por %p2259_p8, %p2258_p6 }
  0x62   : > { %p2256_p4 = pneg %p2255_p1 }
  0x63   : > { %p2262_p3 = por %p2261_p13, %p2260_p10 }
  0x65   : > { %p2263_p7 = pnand %p2262_p3, %p2256_p4 }
  0x67   : > { %2266 = shalt.err (!%p2263_p7)
}
  0x68   : > { %s2267_s11 = scalar_lea.vmem %s507_s18, 128  ;;  %s2362_s0 = smov [#allocation5]  }
  0x69   : > { %p2268_p9 = scmp.ne.s32.totalorder %s507_s18, %s2267_s11  ;;  %s2272_s20 = sshll.u32 %s2362_s0, 4  ;;  %s2273_s20 = int_to_ptr.vmem [resolvable:$false] %s2272_s20 }
  0x6a   : > { %s2274_s17 = scalar_lea.vmem %s2273_s20, 256  ;;  %p2275_p1 = scmp.lt.s32.totalorder %s507_s18, %s2273_s20 }
  0x6b   : > { %p2270_p2 = pnand %p2268_p9, %p2224_p0  ;;  %p2276_p12 = scmp.lt.s32.totalorder %s2274_s17, %s2267_s11 }
  0x6d   : > { %p2271_p5 = pneg %p2270_p2  ;;  %p2277_p6 = por %p2276_p12, %p2275_p1 }
  0x6f   : > { %p2278_p8 = pnand %p2277_p6, %p2271_p5 }
  0x71   : > { %2281 = shalt.err (!%p2278_p8)
}
  0x72   : > { %2120 = dma.hbm_to_vmem [thread:$0]  (!%p2564_p11), %s2573_s10, 128, %s507_s18, %s496_s13  }
  0x73   : > { %p2929_p4 = scmp.ne.s32.totalorder %s2919_s29, 0 }
  0x74   : > { %s2624_s12 = sand.u32 (!%p2929_p4), 1, %s2348_s22   ;;  %p2930_p12 = scmp.ne.s32.totalorder (!%p2929_p4), %s2916_s27, 0 }
  0x75   : > { %515 = sbr.rel (%p2929_p4) target bundleno = 2732 (0xaac), region = 84  ;;  %s2627_s23 = sshll.u32 (!%p2929_p4), %s2624_s12, 3 }
  0x76   : > { %s518_s21 = scalar_lea.sflag (!%p2929_p4), [#allocation3], %s2624_s12  ;;  %s521_s19 = scalar_lea.vmem (!%p2929_p4), [#allocation2], %s2627_s23 }
  0x7c   : > { %2327 = dma.done.wait (%p2930_p12), %s518_s21, 128  }
  0x7d   : > { %2329 = vsyncadd (%p2930_p12), %s518_s21, 4294967168  ;;  %s526_s29 = sand.u32 1, %s2480_s25   ;;  %s530_s10 = scalar_lea.vmem [#allocation5], %s2627_s23 }
  0x7e   : > { %s527_s16 = scalar_lea.sflag [#allocation6], %s526_s29 }
  0x7f   : > { %2331 = dma.done.wait (%p2930_p12), %s527_s16, 128  }
  0x80   : > { %2333 = vsyncadd (%p2930_p12), %s527_s16, 4294967168  ;;  %p2931_p11 = scmp.eq.s32.totalorder %s2480_s25, 0 }
  0x82   : > { %2335 = dma.done.wait (%p2931_p11), [#allocation6], 512   ;;  %p2932_p0 = pmov %p2931_p11 }
  0x83   : > { %vm592_vm0 = vcmask 261120   ;;  %v2645_v0 = vld [vmem:[%s521_s19] sm:$0xff]  ;;  %v2363_v10 = vmov 0.0|0.0   ;;  %v624_v11 = vld [vmem:[%s2877_s2 + $0x10] sm:$0xff]  ;;  %v625_v12 = vld [vmem:[%s2877_s2 + $0x18] sm:$0xff]  ;;  %vm2364_vm1 = vmmov 0  }
  0x84   : > { %2337 = vsyncadd (%p2932_p0), [#allocation6], 4294966784  ;;  %v593_v1 = vsel %vm592_vm0, %v2645_v0, 0.0  ;;  %v622_v7 = vld [vmem:[%s2877_s2] sm:$0xff]  ;;  %v623_v8 = vld [vmem:[%s2877_s2 + $0x8] sm:$0xff]  ;;  %2064 = vmatprep.subr.bf16.mxu1 %v2363_v10  ;;  %v2068_v13 = vpack.c.bf16 %v625_v12, %v624_v11  ;;  %v2365_v14 = vmov 0.0  }
  0x85   : > { %594 = vadd.xlane.f32.xlu0 %v593_v1  ;;  %v2065_v9 = vpack.c.bf16 %v623_v8, %v622_v7  ;;  %1969 = vmatprep.mubr.msk.f32.mxu1 %vm2364_vm1, %v2365_v14  ;;  %v1886_v19 = vld [vmem:[%s2883_s8] ss:$0 sm:$0xff]  ;;  %v707_v24 = vld [vmem:[%s2879_s4 + $0x8] sm:$0xff]  ;;  %v589_v25 = vld [vmem:[%s530_s10] sm:$0xff]  ;;  %s2366_s14 = smov 104   ;;  %s2367_s11 = smov 120  }
  0x86   : > { %1983 = vmatprep.subr.mxu0 %v2365_v14  ;;  %1985 = vmatprep.mubr.msk.f32.mxu0 %vm2364_vm1, %v2365_v14  ;;  %v1887_v21 = vld [vmem:[%s2884_s9] ss:$0 sm:$0xff]  ;;  %v708_v29 = vld [vmem:[%s2879_s4 + $0x10] sm:$0xff]  ;;  %v709_v30 = vld [vmem:[%s2879_s4 + $0x18] sm:$0xff]  ;;  %s2368_s0 = smov 112   ;;  %s2369_s20 = smov 96  }
  0x87   : > { %2066 = vmatpush3.bf16.msra.mxu1 %v2065_v9  ;;  %v706_v23 = vld [vmem:[%s2879_s4] sm:$0xff]  ;;  %v2074_v31 = vpack.c.bf16 %v709_v30, %v708_v29  ;;  %vm809_vm2 = vcmask 64512   ;;  %s2370_s10 = smov 8   ;;  %s2371_s30 = smov 16   ;;  %vm1461_vm3 = vcmask 130048   ;;  %vm1463_vm4 = vcmask 195584  }
  0x88   : > { %2067 = vmatprep.subr.bf16.mxu1 %v2363_v10  ;;  %v2071_v27 = vpack.c.bf16 %v707_v24, %v706_v23  ;;  %v1888_v32 = vld [vmem:[%s2878_s3] ss:$0 sm:$0xff]  ;;  %s2933_s21 = sld [smem:[#allocation24_spill]]  ;;  %s2936_s29 = sld [smem:[#allocation21_spill]]  ;;  %vm1681_vm6 = vcmask 523264  }
  0x89   : > { %v1890_v43 = vld [vmem:[%s2880_s5] ss:$0 sm:$0xff]  ;;  %s587_s17 = scalar_lea.vmem [#allocation8], %s2627_s23  ;;  %s2940_s27 = sld [smem:[#allocation26_spill]] }
  0x8a   : > { %s1758_s13 = scalar_lea.sflag [#allocation4], %s2624_s12  ;;  %s2373_s23 = smov [#allocation8]  }
  0x8b   : > { %2069 = vmatpush3.bf16.msra.mxu1 %v2068_v13  ;;  %s2286_s26 = sshll.u32 %s2373_s23, 4  ;;  %s2287_s26 = int_to_ptr.vmem [resolvable:$false] %s2286_s26 }
  0x8c   : > { %2070 = vmatprep.subr.bf16.mxu1 %v2363_v10  ;;  %s2288_s28 = scalar_lea.vmem %s2287_s26, 256 }
  0x8e   : > { %s2934_s19 = smov %s2933_s21 }
 0x112   : > { %v595_v2 = vpop.xlane.xlu0 %594 }
 0x113   : > { %v597_v3 = vmul.f32 0.03125, %v595_v2 }
 0x115   : > { %v598_v4 = vsub.f32 %v2645_v0, %v597_v3 }
 0x117   : > { %v599_v5 = vmul.f32 %v598_v4, %v598_v4 }
 0x119   : > { %v600_v6 = vsel %vm592_vm0, %v599_v5, 0.0 }
 0x11a   : > { %601 = vadd.xlane.f32.xlu0 %v600_v6 }
 0x1a7   : > { %v602_v15 = vpop.xlane.xlu0 %601 }
 0x1a8   : > { %v603_v16 = vmul.f32 0.03125, %v602_v15 }
 0x1aa   : > { %v604_v17 = vadd.f32 1e-05, %v603_v16 }
 0x1ac   : > { %2174 = vrsqrt.f32 %v604_v17 }
 0x1b6   : > { %v2175_v18 = vpop.eup %2174 }
 0x1b7   : > { %v606_v20 = vmul.f32 %v2175_v18, %v598_v4 }
 0x1b9   : > { %v613_v22 = vmul.f32 %v1886_v19, %v606_v20 }
 0x1bb   : > { %v620_v26 = vadd.f32 %v1887_v21, %v613_v22 }
 0x1bd   : > { %v621_v28 = vadd.f32 %v620_v26, %v589_v25 }
 0x1bf   : > { %1970 = vmatmul.mubr.msk.f32.vlgmr.msra.gmra.mrb[0].mxu1 %vm592_vm0, %v621_v28 }
 0x1c0   : > { %2072 = vmatpush3.bf16.msra.mxu1 %v2071_v27  ;;  %1980 = vmatprep.mubr.msk.f32.mxu1 %vm2364_vm1, %v2365_v14 }
 0x1c1   : > { %2073 = vmatprep.subr.bf16.mxu1 %v2363_v10 }
 0x1c4   : > { %2075 = vmatpush3.bf16.msra.mxu1 %v2074_v31 }
 0x1c5   : > { %1988 = vmatprep.subr.mxu1 %v2365_v14 }
 0x1c7   : > { %1981 = vmatmul.mubr.msk.f32.vlgmr.msra.gmra.mrb[2].mxu1 %vm592_vm0, %v620_v26 }
 0x1c8   : > { %1990 = vmatprep.mubr.msk.f32.mxu1 %vm2364_vm1, %v2365_v14 }
 0x292   : > { %v702_v33 = vpop.f32.mrb[0].mxu1 }
 0x293   : > { %v703_v34 = vadd.f32 %v1888_v32, %v702_v33  ;;  %v1971_v35 = vpop.f32.mrb[1].mxu1 }
 0x294   : > { %v1465_v35 = vld [vmem:[%s2881_s6] sm:$0xff] }
 0x295   : > { %795 = vrot.lane.b32.xlu0 %v703_v34, %s2366_s14  ;;  %791 = vrot.lane.b32.xlu1 %v703_v34, %s2367_s11 }
 0x299   : > { %793 = vrot.lane.b32.xlu1 %v703_v34, %s2368_s0 }
 0x29a   : > { %v786_v36 = vpop.f32.mrb[2].mxu1 }
 0x29b   : > { %v1982_v37 = vpop.f32.mrb[3].mxu1  ;;  %v787_v45 = vadd.f32 %v1890_v43, %v786_v36  ;;  %v1466_v36 = vld [vmem:[%s2881_s6 + $0x8] sm:$0xff] }
 0x29c   : > { %v2077_v37 = vpack.c.bf16 %v1466_v36, %v1465_v35 }
 0x29d   : > { %807 = vrot.lane.b32.xlu1 %v703_v34, %s2369_s20 }
 0x307   : > { %v792_v38 = vpop.permute.xlu1 %791  ;;  %v796_v40 = vpop.permute.xlu0 %795 }
 0x308   : > { %884 = vrot.lane.b32.xlu1 %v792_v38, %s2369_s20 }
 0x30b   : > { %v794_v39 = vpop.permute.xlu1 %793 }
 0x30c   : > { %960 = vrot.lane.b32.xlu1 %v794_v39, %s2369_s20 }
 0x30f   : > { %v808_v41 = vpop.permute.xlu1 %807 }
 0x310   : > { %1036 = vrot.lane.b32.xlu1 %v796_v40, %s2369_s20  ;;  %1984 = vmatpush3.xpose.msk.msra.mxu0 %vm809_vm2, %v808_v41  ;;  %s2935_s20 = sld [smem:[#allocation20_spill]] }
 0x311   : > { %1993 = vmatprep.subr.mxu0 %v2365_v14 }
 0x313   : > { %1986 = vmatmul.mubr.msk.f32.vlgmr.msra.gmra.mrb[0].mxu0 %vm809_vm2, %v703_v34 }
 0x314   : > { %1995 = vmatprep.mubr.msk.f32.mxu0 %vm2364_vm1, %v2365_v14 }
 0x37a   : > { %v885_v42 = vpop.permute.xlu1 %884 }
 0x37b   : > { %1989 = vmatpush3.xpose.msk.msra.mxu1 %vm809_vm2, %v885_v42 }
 0x37c   : > { %1998 = vmatprep.subr.mxu1 %v2365_v14 }
 0x37e   : > { %1991 = vmatmul.mubr.msk.f32.vlgmr.msra.gmra.mrb[4].mxu1 %vm809_vm2, %v792_v38  ;;  %v961_v44 = vpop.permute.xlu1 %960  ;;  %v1467_v38 = vld [vmem:[%s2881_s6 + $0x10] sm:$0xff] }
 0x37f   : > { %1994 = vmatpush3.xpose.msk.msra.mxu0 %vm809_vm2, %v961_v44  ;;  %2000 = vmatprep.mubr.msk.f32.mxu1 %vm2364_vm1, %v2365_v14 }
 0x380   : > { %2003 = vmatprep.subr.mxu0 %v2365_v14 }
 0x382   : > { %1996 = vmatmul.mubr.msk.f32.vlgmr.msra.gmra.mrb[2].mxu0 %vm809_vm2, %v794_v39  ;;  %v1037_v46 = vpop.permute.xlu1 %1036  ;;  %v1468_v39 = vld [vmem:[%s2881_s6 + $0x18] sm:$0xff] }
 0x383   : > { %1999 = vmatpush3.xpose.msk.msra.mxu1 %vm809_vm2, %v1037_v46  ;;  %2004 = vmatpush3.msra.mxu0 %v787_v45 }
 0x384   : > { %2008 = vmatprep.subr.mxu1 %v2365_v14  ;;  %2005 = vmatprep.mubr.msk.f32.mxu0 %vm2364_vm1, %v2365_v14 }
 0x385   : > { %2013 = vmatprep.subr.mxu0 %v2365_v14 }
 0x386   : > { %2001 = vmatmul.mubr.msk.f32.vlgmr.msra.gmra.mrb[6].mxu1 %vm809_vm2, %v796_v40  ;;  %v2080_v40 = vpack.c.bf16 %v1468_v39, %v1467_v38 }
 0x387   : > { %2010 = vmatprep.mubr.msk.f32.mxu1 %vm2364_vm1, %v2365_v14 }
 0x3e6   : > { %v880_v47 = vpop.f32.mrb[0].mxu0 }
 0x3e7   : > { %v1987_v48 = vpop.f32.mrb[1].mxu0  ;;  %v1112_v49 = vsel %vm809_vm2, %v880_v47, -inf }
 0x3e8   : > { %1113 = vmax.xlane.f32.xlu1 %v1112_v49 }
 0x451   : > { %v956_v50 = vpop.f32.mrb[4].mxu1 }
 0x452   : > { %v1992_v51 = vpop.f32.mrb[5].mxu1  ;;  %v1115_v52 = vsel %vm809_vm2, %v956_v50, -inf }
 0x453   : > { %1116 = vmax.xlane.f32.xlu0 %v1115_v52 }
 0x455   : > { %v1032_v53 = vpop.f32.mrb[2].mxu0 }
 0x456   : > { %v1997_v54 = vpop.f32.mrb[3].mxu0  ;;  %v1118_v55 = vsel %vm809_vm2, %v1032_v53, -inf }
 0x457   : > { %1119 = vmax.xlane.f32.xlu1 %v1118_v55 }
 0x459   : > { %v1108_v56 = vpop.f32.mrb[6].mxu1 }
 0x45a   : > { %v2002_v57 = vpop.f32.mrb[7].mxu1  ;;  %v1121_v58 = vsel %vm809_vm2, %v1108_v56, -inf }
 0x45b   : > { %1122 = vmax.xlane.f32.xlu0 %v1121_v58 }
 0x468   : > { %798 = vrot.lane.b32.xlu1 %v787_v45, %s2367_s11 }
 0x475   : > { %v1114_v59 = vpop.xlane.xlu1 %1113 }
 0x476   : > { %v1124_v60 = vsub.f32 %v880_v47, %v1114_v59 }
 0x478   : > { %v1128_v61 = vmul.f32 1.442695, %v1124_v60 }
 0x47a   : > { %2176 = vpow2.f32 %v1128_v61 }
 0x484   : > { %v2177_v62 = vpop.eup %2176 }
 0x485   : > { %v1136_v63 = vsel %vm809_vm2, %v2177_v62, 0.0 }
 0x48c   : > { %1137 = vadd.xlane.f32.xlu1 %v1136_v63  ;;  %v1579_v63 = vld [vmem:[#allocation7] sm:$0xff] }
 0x4e0   : > { %v1117_v1 = vpop.xlane.xlu0 %1116 }
 0x4e1   : > { %v1125_v2 = vsub.f32 %v956_v50, %v1117_v1  ;;  %v1580_v1 = vld [vmem:[#allocation7 + $0x8] sm:$0xff] }
 0x4e3   : > { %v1130_v3 = vmul.f32 1.442695, %v1125_v2  ;;  %v2083_v2 = vpack.c.bf16 %v1580_v1, %v1579_v63 }
 0x4e4   : > { %v1120_v4 = vpop.xlane.xlu1 %1119 }
 0x4e5   : > { %2178 = vpow2.f32 %v1130_v3  ;;  %v1126_v5 = vsub.f32 %v1032_v53, %v1120_v4  ;;  %v1904_v53 = vld [vmem:[%s2882_s7] ss:$0 sm:$0xff]  ;;  %v1582_v3 = vld [vmem:[#allocation7 + $0x18] sm:$0xff] }
 0x4e7   : > { %v1132_v6 = vmul.f32 1.442695, %v1126_v5  ;;  %v1666_v5 = vld [vmem:[%s2933_s21] sm:$0xff]  ;;  %s1771_s21 = sshll.u32 %s587_s17, 4  ;;  %s2832_s21 = int_to_ptr.vmem [resolvable:$true] %s1771_s21 }
 0x4e8   : > { %v799_v7 = vpop.permute.xlu1 %798  ;;  %v1123_v8 = vpop.xlane.xlu0 %1122  ;;  %p2289_p9 = scmp.lt.s32.totalorder %s2832_s21, %s2287_s26 }
 0x4e9   : > { %2180 = vpow2.f32 %v1132_v6  ;;  %v1127_v9 = vsub.f32 %v1108_v56, %v1123_v8  ;;  %2009 = vmatpush3.msra.mxu1 %v799_v7  ;;  %v1667_v6 = vld [vmem:[%s2934_s19 + $0x8] sm:$0xff]  ;;  %v1668_v7 = vld [vmem:[%s2934_s19 + $0x10] sm:$0xff] }
 0x4ea   : > { %2018 = vmatprep.subr.mxu1 %v2365_v14  ;;  %v2089_v8 = vpack.c.bf16 %v1667_v6, %v1666_v5 }
 0x4eb   : > { %v1134_v11 = vmul.f32 1.442695, %v1127_v9  ;;  %v1669_v9 = vld [vmem:[%s2934_s19 + $0x18] sm:$0xff] }
 0x4ed   : > { %2182 = vpow2.f32 %v1134_v11  ;;  %v2092_v11 = vpack.c.bf16 %v1669_v9, %v1668_v7 }
 0x4ef   : > { %v2179_v12 = vpop.eup %2178 }
 0x4f0   : > { %v1139_v13 = vsel %vm809_vm2, %v2179_v12, 0.0 }
 0x4f1   : > { %1140 = vadd.xlane.f32.xlu0 %v1139_v13  ;;  %v1671_v13 = vld [vmem:[%s2934_s19 + $0x28] sm:$0xff] }
 0x4f3   : > { %v2181_v15 = vpop.eup %2180 }
 0x4f4   : > { %v1142_v16 = vsel %vm809_vm2, %v2181_v15, 0.0 }
 0x4f5   : > { %1143 = vadd.xlane.f32.xlu1 %v1142_v16 }
 0x4f7   : > { %v2183_v17 = vpop.eup %2182 }
 0x4f8   : > { %v1145_v18 = vsel %vm809_vm2, %v2183_v17, 0.0 }
 0x4f9   : > { %1146 = vadd.xlane.f32.xlu0 %v1145_v18 }
 0x506   : > { %804 = vrot.lane.b32.xlu1 %v787_v45, %s2366_s14  ;;  %s2372_s14 = smov 24  }
 0x50f   : > { %801 = vrot.lane.b32.xlu0 %v787_v45, %s2368_s0  ;;  %s2939_s0 = sld [smem:[#allocation25_spill]] }
 0x519   : > { %v1138_v19 = vpop.xlane.xlu1 %1137 }
 0x51a   : > { %2184 = vrcp.f32 %v1138_v19 }
 0x524   : > { %v2185_v20 = vpop.eup %2184 }
 0x525   : > { %v1152_v21 = vmul.f32 %v2185_v20, %v2177_v62  ;;  %v1906_v20 = vld [vmem:[%s2935_s20] ss:$0 sm:$0xff]  ;;  %s1913_s20 = sshll.u32 %s2480_s25, 7  ;;  %s2282_s25 = scalar_lea.vmem %s2832_s21, 128 }
 0x526   : > { %s2830_s18 = scalar_lea.hbm %s2940_s27, %s1913_s20  ;;  %p2283_p10 = scmp.ne.s32.totalorder %s2832_s21, %s2282_s25 }
 0x527   : > { %2006 = vmatmul.mubr.msk.f32.vlgmr.msra.gmra.mrb[4].mxu0 %vm809_vm2, %v1152_v21  ;;  %p2290_p2 = scmp.lt.s32.totalorder %s2288_s28, %s2282_s25 }
 0x528   : > { %2015 = vmatprep.mubr.msk.f32.mxu0 %vm2364_vm1, %v2365_v14 }
 0x529   : > { %p2291_p5 = por %p2290_p2, %p2289_p9 }
 0x57e   : > { %v1141_v22 = vpop.xlane.xlu0 %1140 }
 0x57f   : > { %2186 = vrcp.f32 %v1141_v22  ;;  %v1907_v22 = vld [vmem:[%s2936_s29] ss:$0 sm:$0xff] }
 0x582   : > { %v1144_v23 = vpop.xlane.xlu1 %1143 }
 0x583   : > { %2188 = vrcp.f32 %v1144_v23 }
 0x586   : > { %v1147_v24 = vpop.xlane.xlu0 %1146  ;;  %v805_v28 = vpop.permute.xlu1 %804 }
 0x587   : > { %2190 = vrcp.f32 %v1147_v24 }
 0x589   : > { %v2187_v25 = vpop.eup %2186 }
 0x58a   : > { %v1153_v26 = vmul.f32 %v2187_v25, %v2179_v12  ;;  %v802_v27 = vpop.permute.xlu0 %801  ;;  %v1670_v12 = vld [vmem:[%s2934_s19 + $0x20] sm:$0xff]  ;;  %v1673_v25 = vld [vmem:[%s2934_s19 + $0x38] sm:$0xff] }
 0x58b   : > { %2014 = vmatpush3.msra.mxu0 %v802_v27 }
 0x58c   : > { %2011 = vmatmul.mubr.msk.f32.vlgmr.msra.gmra.mrb[8].mxu1 %vm809_vm2, %v1153_v26  ;;  %2076 = vmatprep.subr.bf16.mxu0 %v2363_v10 }
 0x58d   : > { %v2189_v29 = vpop.eup %2188  ;;  %2019 = vmatpush3.msra.mxu1 %v805_v28  ;;  %2020 = vmatprep.mubr.msk.f32.mxu1 %vm2364_vm1, %v2365_v14 }
 0x58e   : > { %v1154_v30 = vmul.f32 %v2189_v29, %v2181_v15  ;;  %2082 = vmatprep.subr.bf16.mxu1 %v2363_v10  ;;  %v2095_v15 = vpack.c.bf16 %v1671_v13, %v1670_v12 }
 0x590   : > { %2016 = vmatmul.mubr.msk.f32.vlgmr.msra.gmra.mrb[6].mxu0 %vm809_vm2, %v1154_v30 }
 0x591   : > { %v2191_v31 = vpop.eup %2190  ;;  %2031 = vmatprep.mubr.msk.f32.mxu0 %vm2364_vm1, %v2365_v14  ;;  %2078 = vmatpush3.bf16.msra.mxu0 %v2077_v37 }
 0x592   : > { %v1155_v32 = vmul.f32 %v2191_v31, %v2183_v17  ;;  %2079 = vmatprep.subr.bf16.mxu0 %v2363_v10 }
 0x594   : > { %2021 = vmatmul.mubr.msk.f32.vlgmr.msra.gmra.mrb[10].mxu1 %vm809_vm2, %v1155_v32 }
 0x595   : > { %2042 = vmatprep.mubr.msk.f32.mxu1 %vm2364_vm1, %v2365_v14  ;;  %2081 = vmatpush3.bf16.msra.mxu0 %v2080_v40 }
 0x596   : > { %2088 = vmatprep.subr.bf16.mxu0 %v2363_v10  ;;  %2084 = vmatpush3.bf16.msra.mxu1 %v2083_v2 }
 0x597   : > { %2085 = vmatprep.subr.bf16.mxu1 %v2363_v10 }
 0x5fa   : > { %v1225_v33 = vpop.f32.mrb[4].mxu0 }
 0x5fb   : > { %v2007_v34 = vpop.f32.mrb[5].mxu0 }
 0x65f   : > { %v1298_v41 = vpop.f32.mrb[8].mxu1 }
 0x660   : > { %1449 = vrot.lane.b32.xlu1 %v1298_v41, %s2370_s10  ;;  %v2012_v42 = vpop.f32.mrb[9].mxu1  ;;  %s2937_s10 = sld [smem:[#allocation23_spill]] }
 0x663   : > { %v1371_v43 = vpop.f32.mrb[6].mxu0 }
 0x664   : > { %1453 = vrot.lane.b32.xlu0 %v1371_v43, %s2371_s30  ;;  %v2017_v44 = vpop.f32.mrb[7].mxu0  ;;  %s2938_s30 = sld [smem:[#allocation18_spill]] }
 0x666   : > { %v1908_v27 = vld [vmem:[%s2937_s10] ss:$0 sm:$0xff] }
 0x667   : > { %v1444_v45 = vpop.f32.mrb[10].mxu1 }
 0x668   : > { %1457 = vrot.lane.b32.xlu1 %v1444_v45, %s2372_s14  ;;  %v2022_v46 = vpop.f32.mrb[11].mxu1 }
 0x66a   : > { %p2941_p13 = scmp.ne.s32.totalorder %s2938_s30, 0 }
 0x66c   : > { %p2284_p3 = pnand %p2283_p10, %p2941_p13 }
 0x66e   : > { %p2285_p7 = pneg %p2284_p3 }
 0x670   : > { %p2292_p1 = pnand %p2291_p5, %p2285_p7 }
 0x6d2   : > { %v1450_v47 = vpop.permute.xlu1 %1449 }
 0x6d3   : > { %v1460_v49 = vsel %vm809_vm2, %v1225_v33, %v1450_v47  ;;  %v1910_v33 = vld [vmem:[%s2939_s0] ss:$0 sm:$0xff] }
 0x6d6   : > { %v1454_v48 = vpop.permute.xlu0 %1453 }
 0x6d7   : > { %v1462_v50 = vsel %vm1461_vm3, %v1460_v49, %v1454_v48 }
 0x6da   : > { %v1458_v51 = vpop.permute.xlu1 %1457 }
 0x6db   : > { %v1464_v52 = vsel %vm1463_vm4, %v1462_v50, %v1458_v51 }
 0x6dc   : > { %2032 = vmatmul.mubr.msk.f32.vlgmr.msra.gmra.mrb[8].mxu0 %vm592_vm0, %v1464_v52 }
 0x6dd   : > { %2061 = vmatprep.mubr.msk.f32.mxu0 %vm2364_vm1, %v2365_v14  ;;  %2090 = vmatpush3.bf16.msra.mxu0 %v2089_v8 }
 0x6de   : > { %2091 = vmatprep.subr.bf16.mxu0 %v2363_v10 }
 0x6e1   : > { %2093 = vmatpush3.bf16.msra.mxu0 %v2092_v11 }
 0x6e2   : > { %2094 = vmatprep.subr.bf16.mxu0 %v2363_v10 }
 0x6e5   : > { %2096 = vmatpush3.bf16.msra.mxu0 %v2095_v15 }
 0x6e6   : > { %2097 = vmatprep.subr.bf16.mxu0 %v2363_v10  ;;  %v1672_v10 = vld [vmem:[%s2934_s19 + $0x30] sm:$0xff] }
 0x6e7   : > { %v2098_v26 = vpack.c.bf16 %v1673_v25, %v1672_v10 }
 0x6e9   : > { %2099 = vmatpush3.bf16.msra.mxu0 %v2098_v26 }
 0x7af   : > { %v1545_v54 = vpop.f32.mrb[8].mxu0 }
 0x7b0   : > { %v1546_v55 = vadd.f32 %v1904_v53, %v1545_v54  ;;  %v2033_v56 = vpop.f32.mrb[9].mxu0 }
 0x7b2   : > { %v2777_v57 = vadd.f32 %v1546_v55, %v2645_v0  ;;  %v1581_v0 = vld [vmem:[#allocation7 + $0x10] sm:$0xff] }
 0x7b3   : > { %v2086_v4 = vpack.c.bf16 %v1582_v3, %v1581_v0 }
 0x7b4   : > { %v1552_v58 = vsel %vm592_vm0, %v2777_v57, 0.0 }
 0x7b5   : > { %1553 = vadd.xlane.f32.xlu0 %v1552_v58  ;;  %2087 = vmatpush3.bf16.msra.mxu1 %v2086_v4 }
 0x842   : > { %v1554_v59 = vpop.xlane.xlu0 %1553 }
 0x843   : > { %v1555_v60 = vmul.f32 0.03125, %v1554_v59 }
 0x845   : > { %v1556_v61 = vsub.f32 %v2777_v57, %v1555_v60 }
 0x847   : > { %v1557_v62 = vmul.f32 %v1556_v61, %v1556_v61 }
 0x849   : > { %v1558_v14 = vsel %vm592_vm0, %v1557_v62, 0.0 }
 0x84a   : > { %1559 = vadd.xlane.f32.xlu1 %v1558_v14 }
 0x8d7   : > { %v1560_v16 = vpop.xlane.xlu1 %1559 }
 0x8d8   : > { %v1561_v17 = vmul.f32 0.03125, %v1560_v16 }
 0x8da   : > { %v1562_v18 = vadd.f32 1e-05, %v1561_v17 }
 0x8dc   : > { %2192 = vrsqrt.f32 %v1562_v18 }
 0x8e6   : > { %v2193_v19 = vpop.eup %2192 }
 0x8e7   : > { %v1564_v21 = vmul.f32 %v2193_v19, %v1556_v61 }
 0x8e9   : > { %v1571_v23 = vmul.f32 %v1906_v20, %v1564_v21 }
 0x8eb   : > { %v1578_v24 = vadd.f32 %v1907_v22, %v1571_v23 }
 0x8ed   : > { %2043 = vmatmul.mubr.msk.f32.vlgmr.msra.gmra.mrb[12].mxu1 %vm592_vm0, %v1578_v24 }
 0x9c0   : > { %v1659_v28 = vpop.f32.mrb[12].mxu1 }
 0x9c1   : > { %v1660_v29 = vadd.f32 %v1908_v27, %v1659_v28  ;;  %v2044_v30 = vpop.f32.mrb[13].mxu1 }
 0x9c3   : > { %vm1663_vm5 = vcmp.gt.f32.partialorder %v1660_v29, 0.0  ;;  %v1664_v31 = vmul.f32 0.01, %v1660_v29 }
 0x9c5   : > { %v1665_v32 = vsel %vm1663_vm5, %v1660_v29, %v1664_v31 }
 0x9c6   : > { %2062 = vmatmul.mubr.msk.f32.vlgmr.msra.gmra.mrb[10].mxu0 %vm1681_vm6, %v1665_v32 }
 0xa99   : > { %v1751_v34 = vpop.f32.mrb[10].mxu0 }
 0xa9a   : > { %v1752_v35 = vadd.f32 %v1910_v33, %v1751_v34  ;;  %v2063_v36 = vpop.f32.mrb[11].mxu0 }
 0xa9c   : > { %v1755_v37 = vadd.f32 %v1752_v35, %v2777_v57 }
 0xa9e   : > { %1756 = vst.msk [vmem:[%s587_s17] sm:$0xff] %vm592_vm0, %v1755_v37 }
 0xa9f   : > { %2295 = shalt.err (!%p2292_p1)
}
 0xaa0   : > { %s2296_s12 = scalar_lea.hbm %s2830_s18, 128  ;;  %s2300_s11 = scalar_lea.hbm %s2940_s27, 256 }
 0xaa1   : > { %p2297_p6 = scmp.ne.s32.totalorder %s2830_s18, %s2296_s12  ;;  %p2301_p12 = scmp.lt.u32.totalorder %s2830_s18, %s2940_s27 }
 0xaa2   : > { %p2302_p11 = scmp.lt.u32.totalorder %s2300_s11, %s2296_s12  ;;  %p2304_p10 = scmp.lt.u32.totalorder %s2296_s12, %s2830_s18 }
 0xaa3   : > { %p2298_p8 = pnand %p2297_p6, %p2941_p13 }
 0xaa4   : > { %p2303_p0 = por %p2302_p11, %p2301_p12 }
 0xaa5   : > { %p2299_p4 = pneg %p2298_p8 }
 0xaa6   : > { %p2305_p3 = por %p2304_p10, %p2303_p0 }
 0xaa8   : > { %p2306_p7 = pnand %p2305_p3, %p2299_p4 }
 0xaaa   : > { %2309 = shalt.err (!%p2306_p7)
}
 0xaab   : > { %2108 = dma.vmem_to_hbm [thread:$0]  (%p2941_p13), %s2832_s21, 128, %s2830_s18, %s1758_s13  }
 0xaac PF: > { %s2942_s17 = sld [smem:[#allocation13_spill]]  ;;  %s2943_s29 = sld [smem:[#allocation15_spill]] }
 0xaad   : > { %p2945_p2 = scmp.ge.s32.totalorder %s2356_s24, 2 }
 0xab2   : > { %s1783_s16 = sand.u32 1, %s2942_s17   ;;  %p2944_p9 = scmp.ne.s32.totalorder %s2943_s29, 0 }
 0xab3   : > { %s1784_s25 = scalar_lea.sflag [#allocation4], %s1783_s16 }
 0xab4   : > { %p2122_p5 = pnand %p2945_p2, %p2944_p9 }
 0xab6   : > { %2339 = dma.done.wait (!%p2122_p5), %s1784_s25, 128  }
 0xab7   : > { %2341 = vsyncadd (!%p2122_p5), %s1784_s25, 4294967168  ;;  %s2946_s24 = sld [smem:[#allocation16_spill]]  ;;  %s2947_s23 = sld [smem:[#allocation14_spill]] }
 0xab8   : > { %s2948_s26 = sld [smem:[#allocation17_spill]]  ;;  %s2949_s21 = smov %s2348_s22 }
 0xabd   : > { %p32_p1 = scmp.ge.s32.totalorder %s2946_s24, 4   ;;  %s2950_s22 = smov %s2947_s23 }
 0xabe   : > { %s2951_s23 = smov %s2948_s26 }
 0xabf   :  { %34 = sbr.rel (!%p32_p1) target bundleno = 16 (0x10), region = 146 }
 0xac6   :  { %1789 = vsyncpa [#allocation3], 1 }
 0xac7   :  { %1791 = vsyncpa [#allocation3 + $0x1], 1 }
 0xac8   :  { %1792 = vsyncpa [#allocation6], 1 }
 0xac9   :  { %1794 = vsyncpa [#allocation6 + $0x1], 1 }
 0xaca   :  { %1795 = vsyncpa [#allocation4], 1 }
 0xacb   :  { %1797 = vsyncpa [#allocation4 + $0x1], 1 }

</bundles_post_ra>
